<compile_context>
chip_gen: v5e
topology: v5e:2x2
jax: 0.10.0
libtpu: 0.0.40
codegen_flags: <defaults>
</compile_context>

<pallas_src>
import jax
import jax.numpy as jnp
from jax.experimental import pallas as pl
from jax.experimental.pallas import tpu as pltpu


def ncds_kernel(x_ref, wbig_ref, bbig_ref, wm1b_ref, wm2_ref, bm2_ref, out_ref):
    f32 = jnp.float32
    bf16 = jnp.bfloat16
    h = wm1b_ref.shape[0]                      # half state dim; D = 2*h
    D = 2 * h

    x = x_ref[...].astype(f32)                 # (TB, D)
    x1 = x[:, :h]
    x2 = x[:, h:]
    x1_b = x1.astype(bf16)

    wbig = wbig_ref[...]                       # bf16 (h, 2h+H) = [Ws | Wt | Wm1a]
    wst = wbig[:, :D]                          # bf16 (h, 2h)   = [Ws | Wt]

    # ------------- fused x1-side matmul: [s_pre | t | m1a] ------------------
    big = (jnp.dot(x1_b, wbig, preferred_element_type=f32)
           + bbig_ref[...])                    # bias = [bs | bt | bm1], f32
    s = jnp.tanh(big[:, :h])                   # (TB, h)
    t = big[:, h:D]                            # (TB, h)
    m1a = big[:, D:]                           # (TB, H): x1 @ Wm1a + bm1

    exp_s = jnp.exp(s)
    z2 = x2 * exp_s + t                        # z1 = x1 (encode)

    # ------------- dynamics MLP (no lane concat for z) ----------------------
    hid = jnp.tanh(
        m1a + jnp.dot(z2.astype(bf16), wm1b_ref[...], preferred_element_type=f32))
    z_dot = (jnp.dot(hid.astype(bf16), wm2_ref[...], preferred_element_type=f32)
             + bm2_ref[...])                   # (TB, D), f32
    z_dot1 = z_dot[:, :h]
    z_dot2 = z_dot[:, h:]

    # ------------- decode: block-triangular inverse Jacobian, analytically --
    #   x_dot1 = z_dot1
    #   x_dot2 = exp(-s) * (z_dot2 - z_dot1@Wt) - x2*(1 - s^2) * (z_dot1@Ws)
    st_dot = jnp.dot(z_dot1.astype(bf16), wst, preferred_element_type=f32)
    zWs = st_dot[:, :h]
    zWt = st_dot[:, h:]
    inv_exp_s = pl.reciprocal(exp_s, approx=True)    # EUP slot, reuses exp(s)
    x_dot2 = inv_exp_s * (z_dot2 - zWt) - (x2 * (1.0 - s * s)) * zWs

    out_ref[:, :h] = z_dot1.astype(out_ref.dtype)
    out_ref[:, h:] = x_dot2.astype(out_ref.dtype)


def _round_up(n, m):
    return ((n + m - 1) // m) * m


def ncds_transform_fast(x, params, *, tb_max=512):
    """Pallas implementation of NCDS_Transform_Fast.forward."""
    ws, bs, wt, bt, wm1, bm1, wm2, bm2 = params
    B, D = x.shape
    h = ws.shape[0]
    H = wm1.shape[1]
    assert D == 2 * h

    f32, bf16 = jnp.float32, jnp.bfloat16

    # One-time wrapper-side packing (hoisted out of the kernel):
    wm1a, wm1b = wm1[:h], wm1[h:]
    w_big = jnp.concatenate([ws, wt, wm1a], axis=1).astype(bf16)   # (h, 2h+H)
    b_big = jnp.concatenate([bs, bt, bm1], axis=1).astype(f32)     # (1, 2h+H)
    wm1b_b = wm1b.astype(bf16)                                      # (h, H)
    wm2_b = wm2.astype(bf16)                                        # (H, D)
    bm2_f = bm2.astype(f32)                                         # (1, D)

    # Batch tiling: pad B up to a multiple of 8 and take the largest tile
    # <= tb_max.  Small B => one grid step (no per-step overhead);
    # large B => 512-row "parallel" tiles (>= 256 rows each for v7x megacore).
    tb = min(tb_max, _round_up(B, 8))
    grid_b = pl.cdiv(B, tb)
    padded_b = grid_b * tb
    xp = x if padded_b == B else jnp.pad(x, ((0, padded_b - B), (0, 0)))

    full = lambda i: (0, 0)                    # weights: same whole block each step
    out = pl.pallas_call(
        ncds_kernel,
        out_shape=jax.ShapeDtypeStruct((padded_b, D), x.dtype),
        grid=(grid_b,),
        in_specs=[
            pl.BlockSpec((tb, D), lambda i: (i, 0)),   # x   (batch-tiled)
            pl.BlockSpec((h, 2 * h + H), full),        # W_big = [Ws | Wt | Wm1a] (bf16)
            pl.BlockSpec((1, 2 * h + H), full),        # b_big = [bs | bt | bm1]
            pl.BlockSpec((h, H), full),                # Wm1b (bf16)
            pl.BlockSpec((H, D), full),                # Wm2  (bf16)
            pl.BlockSpec((1, D), full),                # bm2
        ],
        out_specs=pl.BlockSpec((tb, D), lambda i: (i, 0)),
        compiler_params=pltpu.CompilerParams(
            dimension_semantics=("parallel",),
            vmem_limit_bytes=32 * 1024 * 1024,
        ),
    )(xp, w_big, b_big, wm1b_b, wm2_b, bm2_f)
    return out[:B] if padded_b != B else out


def reference(x, params):
    """Plain-JAX reference matching the PyTorch semantics (explicit full bmm
    with the materialized inverse Jacobian), used to validate the analytic
    in-kernel decode."""
    ws, bs, wt, bt, wm1, bm1, wm2, bm2 = params
    hp = jax.lax.Precision.HIGHEST
    h = ws.shape[0]
    x1, x2 = x[:, :h], x[:, h:]
    s = jnp.tanh(jnp.dot(x1, ws, precision=hp) + bs)
    t = jnp.dot(x1, wt, precision=hp) + bt
    z1, z2 = x1, x2 * jnp.exp(s) + t
    z = jnp.concatenate([z1, z2], axis=-1)
    hid = jnp.tanh(jnp.dot(z, wm1, precision=hp) + bm1)
    z_dot = jnp.dot(hid, wm2, precision=hp) + bm2
    exp_neg_s = jnp.exp(-s)
    coef = (z2 - t) * (1.0 - s * s)
    eye_h = jnp.eye(h, dtype=x.dtype)
    j11 = jnp.broadcast_to(eye_h[None], (x.shape[0], h, h))
    j12 = jnp.zeros_like(j11)
    j21 = -exp_neg_s[:, :, None] * (wt.T[None] + coef[:, :, None] * ws.T[None])
    j22 = exp_neg_s[:, :, None] * eye_h[None]
    inv_jac = jnp.concatenate([jnp.concatenate([j11, j12], 2),
                               jnp.concatenate([j21, j22], 2)], 1)
    return jnp.einsum("bij,bj->bi", inv_jac, z_dot, precision=hp)


if __name__ == "__main__":
    key = jax.random.PRNGKey(0)
    B, h, H = 12, 128, 256          # batch (non-multiple-of-8 to exercise padding),
    D = 2 * h                       # half-state dim, model hidden; state dim D = 2h
    ks = jax.random.split(key, 9)
    scale = 0.05

    x = jax.random.normal(ks[0], (B, D), jnp.float32)
    params = (
        scale * jax.random.normal(ks[1], (h, h), jnp.float32),   # Ws
        scale * jax.random.normal(ks[2], (1, h), jnp.float32),   # bs
        scale * jax.random.normal(ks[3], (h, h), jnp.float32),   # Wt
        scale * jax.random.normal(ks[4], (1, h), jnp.float32),   # bt
        scale * jax.random.normal(ks[5], (D, H), jnp.float32),   # Wm1
        scale * jax.random.normal(ks[6], (1, H), jnp.float32),   # bm1
        scale * jax.random.normal(ks[7], (H, D), jnp.float32),   # Wm2
        scale * jax.random.normal(ks[8], (1, D), jnp.float32),   # bm2
    )

    out = ncds_transform_fast(x, params)
    jax.block_until_ready(out)

    ref = reference(x, params)
    assert out.shape == (B, D)
    assert bool(jnp.all(jnp.isfinite(out)))
    if not jnp.allclose(out, ref, rtol=1e-2, atol=1e-2):
        raise AssertionError(
            f"kernel/reference mismatch, max abs err = {jnp.max(jnp.abs(out - ref))}")

    print("KERNEL_OK")
</pallas_src>

<mosaic_0001>
module attributes {stable_mosaic.version = 11 : i64} {
  func.func @ncds_kernel(%arg0: i32, %arg1: memref<16x256xf32, #tpu.memory_space<vmem>>, %arg2: memref<128x512xbf16, #tpu.memory_space<vmem>>, %arg3: memref<1x512xf32, #tpu.memory_space<vmem>>, %arg4: memref<128x256xbf16, #tpu.memory_space<vmem>>, %arg5: memref<256x256xbf16, #tpu.memory_space<vmem>>, %arg6: memref<1x256xf32, #tpu.memory_space<vmem>>, %arg7: memref<16x256xf32, #tpu.memory_space<vmem>>) attributes {dimension_semantics = [#tpu.dimension_semantics<parallel>], iteration_bounds = array<i64: 1>, scalar_prefetch = 0 : i64, scratch_operands = 0 : i64, tpu.core_type = #tpu.core_type<tc>, window_params = [{transform_indices = @transform_0, window_bounds = array<i64: 16, 256>}, {pipeline_mode = #tpu.pipeline_mode<synchronous>, transform_indices = @transform_1, window_bounds = array<i64: 128, 512>}, {pipeline_mode = #tpu.pipeline_mode<synchronous>, transform_indices = @transform_2, window_bounds = array<i64: 1, 512>}, {pipeline_mode = #tpu.pipeline_mode<synchronous>, transform_indices = @transform_3, window_bounds = array<i64: 128, 256>}, {pipeline_mode = #tpu.pipeline_mode<synchronous>, transform_indices = @transform_4, window_bounds = array<i64: 256, 256>}, {pipeline_mode = #tpu.pipeline_mode<synchronous>, transform_indices = @transform_5, window_bounds = array<i64: 1, 256>}, {transform_indices = @transform_6, window_bounds = array<i64: 16, 256>}]} {
    %c0 = arith.constant 0 : index
    %c0_0 = arith.constant 0 : index
    %0 = vector.load %arg1[%c0, %c0_0] : memref<16x256xf32, #tpu.memory_space<vmem>>, vector<16x256xf32>
    %1 = vector.extract_strided_slice %0 {offsets = [0, 0], sizes = [16, 128], strides = [1, 1]} : vector<16x256xf32> to vector<16x128xf32>
    %2 = vector.extract_strided_slice %0 {offsets = [0, 128], sizes = [16, 128], strides = [1, 1]} : vector<16x256xf32> to vector<16x128xf32>
    %3 = arith.truncf %1 : vector<16x128xf32> to vector<16x128xbf16>
    %c0_1 = arith.constant 0 : index
    %c0_2 = arith.constant 0 : index
    %4 = vector.load %arg2[%c0_1, %c0_2] : memref<128x512xbf16, #tpu.memory_space<vmem>>, vector<128x512xbf16>
    %5 = vector.extract_strided_slice %4 {offsets = [0, 0], sizes = [128, 256], strides = [1, 1]} : vector<128x512xbf16> to vector<128x256xbf16>
    %cst = arith.constant dense<0.000000e+00> : vector<16x512xf32>
    %6 = tpu.matmul %3, %4, %cst {dimension_numbers = #tpu.dot_dimension_numbers<[1], [0], [0], [1], [0, 0, 1, 1], [], []>} : vector<16x128xbf16>, vector<128x512xbf16>, vector<16x512xf32> -> vector<16x512xf32>
    %c0_3 = arith.constant 0 : index
    %c0_4 = arith.constant 0 : index
    %7 = vector.load %arg3[%c0_3, %c0_4] : memref<1x512xf32, #tpu.memory_space<vmem>>, vector<1x512xf32>
    %8 = vector.broadcast %7 : vector<1x512xf32> to vector<16x512xf32>
    %9 = arith.addf %6, %8 : vector<16x512xf32>
    %10 = vector.extract_strided_slice %9 {offsets = [0, 0], sizes = [16, 128], strides = [1, 1]} : vector<16x512xf32> to vector<16x128xf32>
    %11 = math.tanh %10 : vector<16x128xf32>
    %12 = vector.extract_strided_slice %9 {offsets = [0, 128], sizes = [16, 128], strides = [1, 1]} : vector<16x512xf32> to vector<16x128xf32>
    %13 = vector.extract_strided_slice %9 {offsets = [0, 256], sizes = [16, 256], strides = [1, 1]} : vector<16x512xf32> to vector<16x256xf32>
    %14 = math.exp %11 : vector<16x128xf32>
    %15 = arith.mulf %2, %14 : vector<16x128xf32>
    %16 = arith.addf %15, %12 : vector<16x128xf32>
    %17 = arith.truncf %16 : vector<16x128xf32> to vector<16x128xbf16>
    %c0_5 = arith.constant 0 : index
    %c0_6 = arith.constant 0 : index
    %18 = vector.load %arg4[%c0_5, %c0_6] : memref<128x256xbf16, #tpu.memory_space<vmem>>, vector<128x256xbf16>
    %cst_7 = arith.constant dense<0.000000e+00> : vector<16x256xf32>
    %19 = tpu.matmul %17, %18, %cst_7 {dimension_numbers = #tpu.dot_dimension_numbers<[1], [0], [0], [1], [0, 0, 1, 1], [], []>} : vector<16x128xbf16>, vector<128x256xbf16>, vector<16x256xf32> -> vector<16x256xf32>
    %20 = arith.addf %13, %19 : vector<16x256xf32>
    %21 = math.tanh %20 : vector<16x256xf32>
    %22 = arith.truncf %21 : vector<16x256xf32> to vector<16x256xbf16>
    %c0_8 = arith.constant 0 : index
    %c0_9 = arith.constant 0 : index
    %23 = vector.load %arg5[%c0_8, %c0_9] : memref<256x256xbf16, #tpu.memory_space<vmem>>, vector<256x256xbf16>
    %cst_10 = arith.constant dense<0.000000e+00> : vector<16x256xf32>
    %24 = tpu.matmul %22, %23, %cst_10 {dimension_numbers = #tpu.dot_dimension_numbers<[1], [0], [0], [1], [0, 0, 1, 1], [], []>} : vector<16x256xbf16>, vector<256x256xbf16>, vector<16x256xf32> -> vector<16x256xf32>
    %c0_11 = arith.constant 0 : index
    %c0_12 = arith.constant 0 : index
    %25 = vector.load %arg6[%c0_11, %c0_12] : memref<1x256xf32, #tpu.memory_space<vmem>>, vector<1x256xf32>
    %26 = vector.broadcast %25 : vector<1x256xf32> to vector<16x256xf32>
    %27 = arith.addf %24, %26 : vector<16x256xf32>
    %28 = vector.extract_strided_slice %27 {offsets = [0, 0], sizes = [16, 128], strides = [1, 1]} : vector<16x256xf32> to vector<16x128xf32>
    %29 = vector.extract_strided_slice %27 {offsets = [0, 128], sizes = [16, 128], strides = [1, 1]} : vector<16x256xf32> to vector<16x128xf32>
    %30 = arith.truncf %28 : vector<16x128xf32> to vector<16x128xbf16>
    %cst_13 = arith.constant dense<0.000000e+00> : vector<16x256xf32>
    %31 = tpu.matmul %30, %5, %cst_13 {dimension_numbers = #tpu.dot_dimension_numbers<[1], [0], [0], [1], [0, 0, 1, 1], [], []>} : vector<16x128xbf16>, vector<128x256xbf16>, vector<16x256xf32> -> vector<16x256xf32>
    %32 = vector.extract_strided_slice %31 {offsets = [0, 0], sizes = [16, 128], strides = [1, 1]} : vector<16x256xf32> to vector<16x128xf32>
    %33 = vector.extract_strided_slice %31 {offsets = [0, 128], sizes = [16, 128], strides = [1, 1]} : vector<16x256xf32> to vector<16x128xf32>
    %34 = tpu.reciprocal %14 {approx = true} : vector<16x128xf32> -> vector<16x128xf32>
    %35 = arith.subf %29, %33 : vector<16x128xf32>
    %36 = arith.mulf %34, %35 : vector<16x128xf32>
    %37 = arith.mulf %11, %11 : vector<16x128xf32>
    %cst_14 = arith.constant 1.000000e+00 : f32
    %38 = vector.broadcast %cst_14 : f32 to vector<16x128xf32>
    %39 = arith.subf %38, %37 : vector<16x128xf32>
    %40 = arith.mulf %2, %39 : vector<16x128xf32>
    %41 = arith.mulf %40, %32 : vector<16x128xf32>
    %42 = arith.subf %36, %41 : vector<16x128xf32>
    %c0_15 = arith.constant 0 : index
    %c0_16 = arith.constant 0 : index
    %43 = vector.load %arg7[%c0_15, %c0_16] : memref<16x256xf32, #tpu.memory_space<vmem>>, vector<16x128xf32>
    tpu.vector_store %arg7[%c0_15, %c0_16], %28 {strides = array<i32>} : memref<16x256xf32, #tpu.memory_space<vmem>>, vector<16x128xf32>,
    %c0_17 = arith.constant 0 : index
    %c128 = arith.constant 128 : index
    %44 = vector.load %arg7[%c0_17, %c128] : memref<16x256xf32, #tpu.memory_space<vmem>>, vector<16x128xf32>
    tpu.vector_store %arg7[%c0_17, %c128], %42 {strides = array<i32>} : memref<16x256xf32, #tpu.memory_space<vmem>>, vector<16x128xf32>,
    return
  }
  func.func @transform_0(%arg0: i32) -> (i32, i32) {
    %c0_i32 = arith.constant 0 : i32
    %c0_i32_0 = arith.constant 0 : i32
    return %arg0, %c0_i32 : i32, i32
  }
  func.func @transform_1(%arg0: i32) -> (i32, i32) {
    %c0_i32 = arith.constant 0 : i32
    %c0_i32_0 = arith.constant 0 : i32
    %c0_i32_1 = arith.constant 0 : i32
    return %c0_i32, %c0_i32_0 : i32, i32
  }
  func.func @transform_2(%arg0: i32) -> (i32, i32) {
    %c0_i32 = arith.constant 0 : i32
    %c0_i32_0 = arith.constant 0 : i32
    %c0_i32_1 = arith.constant 0 : i32
    return %c0_i32, %c0_i32_0 : i32, i32
  }
  func.func @transform_3(%arg0: i32) -> (i32, i32) {
    %c0_i32 = arith.constant 0 : i32
    %c0_i32_0 = arith.constant 0 : i32
    %c0_i32_1 = arith.constant 0 : i32
    return %c0_i32, %c0_i32_0 : i32, i32
  }
  func.func @transform_4(%arg0: i32) -> (i32, i32) {
    %c0_i32 = arith.constant 0 : i32
    %c0_i32_0 = arith.constant 0 : i32
    %c0_i32_1 = arith.constant 0 : i32
    return %c0_i32, %c0_i32_0 : i32, i32
  }
  func.func @transform_5(%arg0: i32) -> (i32, i32) {
    %c0_i32 = arith.constant 0 : i32
    %c0_i32_0 = arith.constant 0 : i32
    %c0_i32_1 = arith.constant 0 : i32
    return %c0_i32, %c0_i32_0 : i32, i32
  }
  func.func @transform_6(%arg0: i32) -> (i32, i32) {
    %c0_i32 = arith.constant 0 : i32
    %c0_i32_0 = arith.constant 0 : i32
    return %arg0, %c0_i32 : i32, i32
  }
}

</mosaic_0001>

<bundles_post_ra>
// kernel: tpu_custom_call.1
= control target key start
LH: loop header
LB: loop body
LE: loop exit
PB: predicated region body
PF: predicated region fallthrough
CT: control target
= control target key end

     0   :  { %11 = vsyncpa [#allocation3], 0  ;;  %s1579_s0 = inlined_call_operand.hbm [shape: f32[16,256], index: 0, kind: input, shape index: {}]   ;;  %s1580_s1 = inlined_call_operand.hbm [shape: bf16[128,512], index: 1, kind: input, shape index: {}]   ;;  %s1581_s2 = inlined_call_operand.hbm [shape: f32[1,512], index: 2, kind: input, shape index: {}]   ;;  %s1582_s3 = inlined_call_operand.hbm [shape: bf16[128,256], index: 3, kind: input, shape index: {}]   ;;  %s1583_s4 = inlined_call_operand.hbm [shape: bf16[256,256], index: 4, kind: input, shape index: {}]   ;;  %s1584_s5 = inlined_call_operand.vmem [shape: f32[1,256], index: 5, kind: input, shape index: {}]   ;;  %s1585_s6 = inlined_call_operand.hbm [shape: f32[16,256], index: 6, kind: output, shape index: {}]  }
   0x1   :  { %12 = vsyncpa [#allocation6], 0 }
   0x2   :  { %13 = vsyncpa [#allocation9], 0 }
   0x3   :  { %14 = vsyncpa [#allocation4], 0  ;;  %s32_s23 = sshll.u32 %s1580_s1, 4  ;;  %s1414_s24 = smov [#allocation5]   ;;  %s33_s23 = int_to_ptr.hbm [resolvable:$true] %s32_s23 }
   0x4   :  { %s34_s25 = sshll.u32 %s1414_s24, 4  ;;  %s56_s28 = sshll.u32 %s1582_s3, 4  ;;  %s35_s25 = int_to_ptr.vmem [resolvable:$true] %s34_s25  ;;  %s57_s28 = int_to_ptr.hbm [resolvable:$true] %s56_s28 }
   0x5   :  { %s1415_s29 = smov 256   ;;  %s1416_s30 = smov 16  }
   0x6   :  { %40 = dma.hbm_to_vmem [thread:$0]  %s33_s23, 4096, %s35_s25, [#allocation6], %s1415_s29, %s1415_s29, %s1416_s30  }
   0x7   :  { %s1417_s7 = smov [#allocation8]   ;;  %s1418_s9 = smov 128  }
   0x8   :  { %s58_s8 = sshll.u32 %s1417_s7, 4  ;;  %s1419_s1 = smov 8   ;;  %s59_s8 = int_to_ptr.vmem [resolvable:$true] %s58_s8 }
   0x9   :  { %64 = dma.hbm_to_vmem [thread:$0]  %s57_s28, 2048, %s59_s8, [#allocation9], %s1418_s9, %s1418_s9, %s1419_s1  }
   0xa   :  { %s19_s12 = sshll.u32 %s1579_s0, 4  ;;  %s1420_s13 = smov [#allocation2]   ;;  %s20_s12 = int_to_ptr.hbm [resolvable:$true] %s19_s12 }
   0xb   :  { %s21_s3 = sshll.u32 %s1420_s13, 4  ;;  %s46_s16 = sshll.u32 %s1581_s2, 4  ;;  %s22_s3 = int_to_ptr.vmem [resolvable:$true] %s21_s3  ;;  %s47_s16 = int_to_ptr.hbm [resolvable:$true] %s46_s16 }
   0xc   :  { %27 = dma.hbm_to_vmem [thread:$0]  %s20_s12, 512, %s22_s3, [#allocation3], %s1415_s29, %s1415_s29, %s1416_s30  }
   0xd   :  { %s1421_s17 = smov [#allocation7]   ;;  %s69_s21 = sshll.u32 %s1583_s4, 4  ;;  %s70_s21 = int_to_ptr.hbm [resolvable:$true] %s69_s21 }
   0xe   :  { %s48_s18 = sshll.u32 %s1421_s17, 4  ;;  %s1422_s0 = smov [#allocation10]   ;;  %s49_s18 = int_to_ptr.vmem [resolvable:$true] %s48_s18 }
   0xf   :  { %51 = dma.hbm_to_vmem [thread:$0]  %s47_s16, 64, %s49_s18, [#allocation6]  }
  0x10   :  { %s71_s22 = sshll.u32 %s1422_s0, 4  ;;  %s72_s22 = int_to_ptr.vmem [resolvable:$true] %s71_s22 }
  0x11   :  { %77 = dma.hbm_to_vmem [thread:$0]  %s70_s21, 4096, %s72_s22, [#allocation9], %s1418_s9, %s1418_s9, %s1419_s1  }
  0x12   :  { %1406 = dma.done.wait [#allocation3], 512  }
  0x13   :  { %1407 = vsyncadd [#allocation3], 4294966784 }
  0x14   :  { %1408 = dma.done.wait [#allocation6], 4160  }
  0x15   :  { %1409 = vsyncadd [#allocation6], 4294963136 }
  0x16   :  { %1410 = dma.done.wait [#allocation9], 6144  }
  0x17   :  { %1411 = vsyncadd [#allocation9], 4294961152  ;;  %v946_v0 = vld [vmem:[#allocation5 + $0xe0] sm:$0xf]  ;;  %v1182_v1 = vld [vmem:[#allocation5 + $0xec] sm:$0xf0] }
  0x18   :  { %v930_v2 = vld [vmem:[#allocation5 + $0xc0] sm:$0xf]  ;;  %v1480_v3 = vor.u32 %v1182_v1, %v946_v0  ;;  %v1178_v4 = vld [vmem:[#allocation5 + $0xcc] sm:$0xf0]  ;;  %v1180_v5 = vld [vmem:[#allocation5 + $0xe4] sm:$0xf] }
  0x19   :  { %v948_v6 = vld [vmem:[#allocation5 + $0xf0] sm:$0xf0]  ;;  %v1483_v7 = vor.u32 %v1178_v4, %v930_v2  ;;  %v1176_v9 = vld [vmem:[#allocation5 + $0xc4] sm:$0xf]  ;;  %v914_v11 = vld [vmem:[#allocation5 + $0xa0] sm:$0xf] }
  0x1a   :  { %307 = vmatpush.bf16.msra.mxu0 %v1480_v3  ;;  %v1485_v8 = vor.u32 %v1180_v5, %v948_v6  ;;  %v932_v10 = vld [vmem:[#allocation5 + $0xd0] sm:$0xf0]  ;;  %v1174_v12 = vld [vmem:[#allocation5 + $0xac] sm:$0xf0]  ;;  %v1172_v14 = vld [vmem:[#allocation5 + $0xa4] sm:$0xf] }
  0x1b   :  { %v1488_v13 = vor.u32 %v1176_v9, %v932_v10  ;;  %v916_v15 = vld [vmem:[#allocation5 + $0xb0] sm:$0xf0]  ;;  %v1491_v16 = vor.u32 %v1174_v12, %v914_v11  ;;  %v898_v17 = vld [vmem:[#allocation5 + $0x80] sm:$0xf]  ;;  %v1170_v18 = vld [vmem:[#allocation5 + $0x8c] sm:$0xf0] }
  0x1c   :  { %321 = vmatpush.bf16.msra.mxu1 %v1485_v8  ;;  %v1494_v19 = vor.u32 %v1172_v14, %v916_v15  ;;  %v882_v20 = vld [vmem:[#allocation5 + $0x60] sm:$0xf]  ;;  %v1168_v21 = vld [vmem:[#allocation5 + $0x84] sm:$0xf]  ;;  %v900_v22 = vld [vmem:[#allocation5 + $0x90] sm:$0xf0]  ;;  %v1497_v23 = vor.u32 %v1170_v18, %v898_v17 }
  0x1d   :  { %v1166_v24 = vld [vmem:[#allocation5 + $0x6c] sm:$0xf0]  ;;  %v954_v25 = vld [vmem:[#allocation5 + $0xe8] sm:$0xf]  ;;  %v1183_v26 = vld [vmem:[#allocation5 + $0xf4] sm:$0xf0]  ;;  %v1500_v31 = vor.u32 %v1168_v21, %v900_v22 }
  0x1e   :  { %308 = vmatpush.bf16.msra.mxu0 %v1483_v7  ;;  %v955_v27 = vor.u32 %v1183_v26, %v954_v25  ;;  %v1181_v28 = vld [vmem:[#allocation5 + $0xec] sm:$0xf]  ;;  %v956_v29 = vld [vmem:[#allocation5 + $0xf8] sm:$0xf0]  ;;  %v938_v30 = vld [vmem:[#allocation5 + $0xc8] sm:$0xf]  ;;  %v1503_v39 = vor.u32 %v1166_v24, %v882_v20 }
  0x1f   :  { %v959_v32 = vor.u32 %v1181_v28, %v956_v29  ;;  %v1179_v33 = vld [vmem:[#allocation5 + $0xd4] sm:$0xf0]  ;;  %v1177_v34 = vld [vmem:[#allocation5 + $0xcc] sm:$0xf]  ;;  %v940_v35 = vld [vmem:[#allocation5 + $0xd8] sm:$0xf0] }
  0x20   :  { %322 = vmatpush.bf16.msra.mxu1 %v1488_v13  ;;  %v1164_v36 = vld [vmem:[#allocation5 + $0x64] sm:$0xf]  ;;  %v884_v37 = vld [vmem:[#allocation5 + $0x70] sm:$0xf0]  ;;  %335 = vmatpush.bf16.msra.mxu2 %v955_v27  ;;  %v939_v38 = vor.u32 %v1179_v33, %v938_v30  ;;  %v866_v40 = vld [vmem:[#allocation5 + $0x40] sm:$0xf]  ;;  %v943_v41 = vor.u32 %v1177_v34, %v940_v35 }
  0x21   :  { %349 = vmatpush.bf16.msra.mxu3 %v959_v32  ;;  %v922_v42 = vld [vmem:[#allocation5 + $0xa8] sm:$0xf]  ;;  %v1175_v43 = vld [vmem:[#allocation5 + $0xb4] sm:$0xf0]  ;;  %v1162_v44 = vld [vmem:[#allocation5 + $0x4c] sm:$0xf0]  ;;  %v1506_v47 = vor.u32 %v1164_v36, %v884_v37 }
  0x22   :  { %309 = vmatpush.bf16.msra.mxu0 %v1491_v16  ;;  %v1173_v45 = vld [vmem:[#allocation5 + $0xac] sm:$0xf]  ;;  %v924_v46 = vld [vmem:[#allocation5 + $0xb8] sm:$0xf0]  ;;  %v1160_v48 = vld [vmem:[#allocation5 + $0x44] sm:$0xf]  ;;  %v923_v50 = vor.u32 %v1175_v43, %v922_v42  ;;  %v1509_v51 = vor.u32 %v1162_v44, %v866_v40 }
  0x23   :  { %v868_v49 = vld [vmem:[#allocation5 + $0x50] sm:$0xf0]  ;;  %v927_v52 = vor.u32 %v1173_v45, %v924_v46  ;;  %v906_v53 = vld [vmem:[#allocation5 + $0x88] sm:$0xf]  ;;  %v1171_v54 = vld [vmem:[#allocation5 + $0x94] sm:$0xf0] }
  0x24   :  { %323 = vmatpush.bf16.msra.mxu1 %v1494_v19  ;;  %336 = vmatpush.bf16.msra.mxu2 %v939_v38  ;;  %v850_v55 = vld [vmem:[#allocation5 + $0x20] sm:$0xf]  ;;  %v1158_v56 = vld [vmem:[#allocation5 + $0x2c] sm:$0xf0]  ;;  %v1512_v57 = vor.u32 %v1160_v48, %v868_v49  ;;  %v1156_v58 = vld [vmem:[#allocation5 + $0x24] sm:$0xf]  ;;  %v907_v60 = vor.u32 %v1171_v54, %v906_v53 }
  0x25   :  { %350 = vmatpush.bf16.msra.mxu3 %v943_v41  ;;  %v852_v59 = vld [vmem:[#allocation5 + $0x30] sm:$0xf0]  ;;  %v1515_v61 = vor.u32 %v1158_v56, %v850_v55  ;;  %v834_v62 = vld [vmem:[#allocation5] sm:$0xf]  ;;  %v1154_v63 = vld [vmem:[#allocation5 + $0xc] sm:$0xf0] }
  0x26   :  { %310 = vmatpush.bf16.msra.mxu0 %v1497_v23  ;;  %v1518_v0 = vor.u32 %v1156_v58, %v852_v59  ;;  %v1152_v1 = vld [vmem:[#allocation5 + $0x4] sm:$0xf]  ;;  %v836_v2 = vld [vmem:[#allocation5 + $0x10] sm:$0xf0]  ;;  %v1521_v4 = vor.u32 %v1154_v63, %v834_v62  ;;  %v1169_v11 = vld [vmem:[#allocation5 + $0x8c] sm:$0xf] }
  0x27   :  { %v100_v5 = vld [vmem:[#allocation2] sm:$0xff]  ;;  %v102_v6 = vld [vmem:[#allocation2 + $0x10] sm:$0xff]  ;;  %v1524_v9 = vor.u32 %v1152_v1, %v836_v2  ;;  %v908_v12 = vld [vmem:[#allocation5 + $0x98] sm:$0xf0]  ;;  %s817_s26 = sshll.u32 %s1585_s6, 4  ;;  %s818_s26 = int_to_ptr.hbm [resolvable:$true] %s817_s26 }
  0x28   :  { %324 = vmatpush.bf16.msra.mxu1 %v1500_v31  ;;  %337 = vmatpush.bf16.msra.mxu2 %v923_v50  ;;  %v1526_v10 = vpack.c.bf16 %v102_v6, %v100_v5  ;;  %v911_v14 = vor.u32 %v1169_v11, %v908_v12  ;;  %v890_v15 = vld [vmem:[#allocation5 + $0x68] sm:$0xf]  ;;  %v1167_v17 = vld [vmem:[#allocation5 + $0x74] sm:$0xf0]  ;;  %v1018_v18 = vld [vmem:[#allocation8 + $0x70] sm:$0xf] }
  0x29   :  { %351 = vmatpush.bf16.msra.mxu3 %v927_v52  ;;  %v891_v20 = vor.u32 %v1167_v17, %v890_v15  ;;  %v1199_v21 = vld [vmem:[#allocation8 + $0x74] sm:$0xf0]  ;;  %v1198_v22 = vld [vmem:[#allocation8 + $0x74] sm:$0xf]  ;;  %v1020_v24 = vld [vmem:[#allocation8 + $0x78] sm:$0xf0] }
  0x2a   :  { %311 = vmatpush.bf16.msra.mxu0 %v1503_v39  ;;  %v1019_v25 = vor.u32 %v1199_v21, %v1018_v18  ;;  %v1023_v26 = vor.u32 %v1198_v22, %v1020_v24  ;;  %v1165_v27 = vld [vmem:[#allocation5 + $0x6c] sm:$0xf]  ;;  %v892_v28 = vld [vmem:[#allocation5 + $0x78] sm:$0xf0]  ;;  %v874_v30 = vld [vmem:[#allocation5 + $0x48] sm:$0xf] }
  0x2b   :  { %v895_v29 = vor.u32 %v1165_v27, %v892_v28  ;;  %v1163_v32 = vld [vmem:[#allocation5 + $0x54] sm:$0xf0]  ;;  %v1010_v33 = vld [vmem:[#allocation8 + $0x60] sm:$0xf]  ;;  %v1197_v35 = vld [vmem:[#allocation8 + $0x64] sm:$0xf0] }
  0x2c   :  { %325 = vmatpush.bf16.msra.mxu1 %v1506_v47  ;;  %338 = vmatpush.bf16.msra.mxu2 %v907_v60  ;;  %v875_v34 = vor.u32 %v1163_v32, %v874_v30  ;;  %v1196_v36 = vld [vmem:[#allocation8 + $0x64] sm:$0xf]  ;;  %v1012_v37 = vld [vmem:[#allocation8 + $0x68] sm:$0xf0]  ;;  %v1011_v38 = vor.u32 %v1197_v35, %v1010_v33  ;;  %v1161_v41 = vld [vmem:[#allocation5 + $0x4c] sm:$0xf] }
  0x2d   :  { %352 = vmatpush.bf16.msra.mxu3 %v911_v14  ;;  %v1015_v40 = vor.u32 %v1196_v36, %v1012_v37  ;;  %v876_v42 = vld [vmem:[#allocation5 + $0x58] sm:$0xf0]  ;;  %v858_v44 = vld [vmem:[#allocation5 + $0x28] sm:$0xf]  ;;  %v1159_v45 = vld [vmem:[#allocation5 + $0x34] sm:$0xf0] }
  0x2e   :  { %312 = vmatpush.bf16.msra.mxu0 %v1509_v51  ;;  %v879_v43 = vor.u32 %v1161_v41, %v876_v42  ;;  %v1002_v46 = vld [vmem:[#allocation8 + $0x50] sm:$0xf]  ;;  %v859_v48 = vor.u32 %v1159_v45, %v858_v44  ;;  %v1195_v49 = vld [vmem:[#allocation8 + $0x54] sm:$0xf0]  ;;  %v1194_v50 = vld [vmem:[#allocation8 + $0x54] sm:$0xf] }
  0x2f   :  { %v1004_v52 = vld [vmem:[#allocation8 + $0x58] sm:$0xf0]  ;;  %v1003_v53 = vor.u32 %v1195_v49, %v1002_v46  ;;  %v1157_v55 = vld [vmem:[#allocation5 + $0x2c] sm:$0xf]  ;;  %v860_v56 = vld [vmem:[#allocation5 + $0x38] sm:$0xf0] }
  0x30   :  { %326 = vmatpush.bf16.msra.mxu1 %v1512_v57  ;;  %339 = vmatpush.bf16.msra.mxu2 %v891_v20  ;;  %v1007_v54 = vor.u32 %v1194_v50, %v1004_v52  ;;  %v863_v58 = vor.u32 %v1157_v55, %v860_v56  ;;  %v842_v59 = vld [vmem:[#allocation5 + $0x8] sm:$0xf]  ;;  %v1155_v60 = vld [vmem:[#allocation5 + $0x14] sm:$0xf0]  ;;  %v994_v62 = vld [vmem:[#allocation8 + $0x40] sm:$0xf] }
  0x31   :  { %353 = vmatpush.bf16.msra.mxu3 %v895_v29  ;;  %v843_v63 = vor.u32 %v1155_v60, %v842_v59  ;;  %v1193_v1 = vld [vmem:[#allocation8 + $0x44] sm:$0xf0]  ;;  %v1192_v2 = vld [vmem:[#allocation8 + $0x44] sm:$0xf]  ;;  %v996_v5 = vld [vmem:[#allocation8 + $0x48] sm:$0xf0] }
  0x32   :  { %313 = vmatpush.bf16.msra.mxu0 %v1515_v61  ;;  %v995_v6 = vor.u32 %v1193_v1, %v994_v62  ;;  %v999_v11 = vor.u32 %v1192_v2, %v996_v5  ;;  %v1153_v12 = vld [vmem:[#allocation5 + $0xc] sm:$0xf]  ;;  %v844_v14 = vld [vmem:[#allocation5 + $0x18] sm:$0xf0]  ;;  %v986_v17 = vld [vmem:[#allocation8 + $0x30] sm:$0xf] }
  0x33   :  { %v847_v15 = vor.u32 %v1153_v12, %v844_v14  ;;  %v1191_v18 = vld [vmem:[#allocation8 + $0x34] sm:$0xf0]  ;;  %v1190_v20 = vld [vmem:[#allocation8 + $0x34] sm:$0xf]  ;;  %v988_v22 = vld [vmem:[#allocation8 + $0x38] sm:$0xf0] }
  0x34   :  { %327 = vmatpush.bf16.msra.mxu1 %v1518_v0  ;;  %340 = vmatpush.bf16.msra.mxu2 %v875_v34  ;;  %v987_v21 = vor.u32 %v1191_v18, %v986_v17  ;;  %v991_v24 = vor.u32 %v1190_v20, %v988_v22  ;;  %v1188_v27 = vld [vmem:[#allocation8 + $0x24] sm:$0xf]  ;;  %v980_v29 = vld [vmem:[#allocation8 + $0x28] sm:$0xf0]  ;;  %v970_v32 = vld [vmem:[#allocation8 + $0x10] sm:$0xf] }
  0x35   :  { %354 = vmatpush.bf16.msra.mxu3 %v879_v43  ;;  %v983_v30 = vor.u32 %v1188_v27, %v980_v29  ;;  %v1187_v33 = vld [vmem:[#allocation8 + $0x14] sm:$0xf0]  ;;  %v1186_v34 = vld [vmem:[#allocation8 + $0x14] sm:$0xf]  ;;  %v972_v36 = vld [vmem:[#allocation8 + $0x18] sm:$0xf0] }
  0x36   :  { %314 = vmatpush.bf16.msra.mxu0 %v1521_v4  ;;  %v971_v35 = vor.u32 %v1187_v33, %v970_v32  ;;  %v975_v37 = vor.u32 %v1186_v34, %v972_v36  ;;  %v1185_v41 = vld [vmem:[#allocation8 + $0x4] sm:$0xf0]  ;;  %v1184_v42 = vld [vmem:[#allocation8 + $0x4] sm:$0xf]  ;;  %v1082_v49 = vld [vmem:[#allocation10 + $0x70] sm:$0xf] }
  0x37   :  { %v1215_v50 = vld [vmem:[#allocation10 + $0x74] sm:$0xf0]  ;;  %v1146_v52 = vld [vmem:[#allocation10 + $0xf0] sm:$0xf]  ;;  %v1214_v55 = vld [vmem:[#allocation10 + $0x74] sm:$0xf] }
  0x38   :  { %328 = vmatpush.bf16.msra.mxu1 %v1524_v9  ;;  %341 = vmatpush.bf16.msra.mxu2 %v859_v48  ;;  %v1084_v56 = vld [vmem:[#allocation10 + $0x78] sm:$0xf0]  ;;  %v1230_v60 = vld [vmem:[#allocation10 + $0xf4] sm:$0xf] }
  0x39   :  { %315 = vmatmul.bf16.vlgmr.msra.gmra.mxu0 %v1526_v10  ;;  %355 = vmatpush.bf16.msra.mxu3 %v863_v58  ;;  %v1087_v59 = vor.u32 %v1214_v55, %v1084_v56  ;;  %v1148_v62 = vld [vmem:[#allocation10 + $0xf8] sm:$0xf0]  ;;  %v103_v22 = vld [vmem:[#allocation2 + $0x18] sm:$0xff]  ;;  %v1130_v55 = vld [vmem:[#allocation10 + $0xd0] sm:$0xf] }
  0x3a   :  { %470 = vmatpush.bf16.msrb.mxu0 %v1019_v25  ;;  %v978_v25 = vld [vmem:[#allocation8 + $0x20] sm:$0xf]  ;;  %v1227_v56 = vld [vmem:[#allocation10 + $0xd4] sm:$0xf0] }
  0x3b   :  { %329 = vmatmul.bf16.vlgmr.msra.gmra.mxu1 %v1526_v10 }
  0x3c   :  { %484 = vmatpush.bf16.msrb.mxu1 %v1023_v26  ;;  %342 = vmatpush.bf16.msra.mxu2 %v843_v63  ;;  %v1189_v26 = vld [vmem:[#allocation8 + $0x24] sm:$0xf0]  ;;  %v1151_v63 = vor.u32 %v1230_v60, %v1148_v62  ;;  %v1210_v60 = vld [vmem:[#allocation10 + $0x54] sm:$0xf]  ;;  %v1068_v62 = vld [vmem:[#allocation10 + $0x58] sm:$0xf0] }
  0x3d   :  { %356 = vmatpush.bf16.msra.mxu3 %v847_v15  ;;  %v979_v28 = vor.u32 %v1189_v26, %v978_v25 }
  0x3e   :  { %471 = vmatpush.bf16.msrb.mxu0 %v1011_v38  ;;  %v1534_v38 = vld [vmem:[#allocation7] sm:$0xf] }
  0x3f   :  { %343 = vmatmul.bf16.vlgmr.msra.gmra.mxu2 %v1526_v10  ;;  %v139_v44 = vperm.slane %v1534_v38, 0  ;;  %v140_v25 = vperm.slane %v1534_v38, 1 }
  0x40   :  { %485 = vmatpush.bf16.msrb.mxu1 %v1015_v40  ;;  %357 = vmatmul.bf16.vlgmr.msra.gmra.mxu3 %v1526_v10  ;;  %v962_v40 = vld [vmem:[#allocation8] sm:$0xf]  ;;  %v964_v10 = vld [vmem:[#allocation8 + $0x8] sm:$0xf0] }
  0x41   :  { %v963_v43 = vor.u32 %v1185_v41, %v962_v40  ;;  %v967_v45 = vor.u32 %v1184_v42, %v964_v10  ;;  %v1074_v40 = vld [vmem:[#allocation10 + $0x60] sm:$0xf]  ;;  %v1213_v41 = vld [vmem:[#allocation10 + $0x64] sm:$0xf0] }
  0x42   :  { %472 = vmatpush.bf16.msrb.mxu0 %v1003_v53  ;;  %v1083_v53 = vor.u32 %v1215_v50, %v1082_v49  ;;  %v1138_v42 = vld [vmem:[#allocation10 + $0xe0] sm:$0xf]  ;;  %v1229_v10 = vld [vmem:[#allocation10 + $0xe4] sm:$0xf0]  ;;  %v1228_v49 = vld [vmem:[#allocation10 + $0xe4] sm:$0xf] }
  0x43   :  { %v1140_v50 = vld [vmem:[#allocation10 + $0xe8] sm:$0xf0] }
  0x44   :  { %486 = vmatpush.bf16.msrb.mxu1 %v1007_v54  ;;  %v1231_v54 = vld [vmem:[#allocation10 + $0xf4] sm:$0xf0]  ;;  %706 = vmatpush.bf16.msrb.mxu2 %v1083_v53  ;;  %v1143_v53 = vor.u32 %v1228_v49, %v1140_v50  ;;  %v1221_v49 = vld [vmem:[#allocation10 + $0xa4] sm:$0xf0]  ;;  %v1204_v50 = vld [vmem:[#allocation10 + $0x24] sm:$0xf] }
  0x45   :  { %v1147_v58 = vor.u32 %v1231_v54, %v1146_v52  ;;  %v1066_v52 = vld [vmem:[#allocation10 + $0x50] sm:$0xf]  ;;  %v1211_v54 = vld [vmem:[#allocation10 + $0x54] sm:$0xf0] }
  0x46   :  { %473 = vmatpush.bf16.msrb.mxu0 %v995_v6 }
  0x47   :  { %720 = vmatpush.bf16.msrb.mxu3 %v1147_v58  ;;  %v1067_v58 = vor.u32 %v1211_v54, %v1066_v52  ;;  %v1044_v52 = vld [vmem:[#allocation10 + $0x28] sm:$0xf0] }
  0x48   :  { %487 = vmatpush.bf16.msrb.mxu1 %v999_v11  ;;  %v101_v11 = vld [vmem:[#allocation2 + $0x8] sm:$0xff]  ;;  %v1047_v54 = vor.u32 %v1204_v50, %v1044_v52 }
  0x4a   :  { %474 = vmatpush.bf16.msrb.mxu0 %v987_v21 }
  0x4c   :  { %488 = vmatpush.bf16.msrb.mxu1 %v991_v24 }
  0x4e   :  { %475 = vmatpush.bf16.msrb.mxu0 %v979_v28 }
  0x50   :  { %489 = vmatpush.bf16.msrb.mxu1 %v983_v30 }
  0x52   :  { %476 = vmatpush.bf16.msrb.mxu0 %v971_v35 }
  0x54   :  { %490 = vmatpush.bf16.msrb.mxu1 %v975_v37 }
  0x56   :  { %477 = vmatpush.bf16.msrb.mxu0 %v963_v43  ;;  %v1075_v43 = vor.u32 %v1213_v41, %v1074_v40 }
  0x58   :  { %491 = vmatpush.bf16.msrb.mxu1 %v967_v45  ;;  %v1076_v45 = vld [vmem:[#allocation10 + $0x68] sm:$0xf0]  ;;  %707 = vmatpush.bf16.msrb.mxu2 %v1075_v43  ;;  %v1116_v43 = vld [vmem:[#allocation10 + $0xb8] sm:$0xf0] }
  0x5a   :  { %734 = vmatpush.bf16.msra.mxu0 %v1087_v59  ;;  %v1131_v59 = vor.u32 %v1227_v56, %v1130_v55  ;;  %v1220_v55 = vld [vmem:[#allocation10 + $0xa4] sm:$0xf]  ;;  %v1108_v56 = vld [vmem:[#allocation10 + $0xa8] sm:$0xf0] }
  0x5c   :  { %748 = vmatpush.bf16.msra.mxu1 %v1151_v63  ;;  %v1226_v63 = vld [vmem:[#allocation10 + $0xd4] sm:$0xf]  ;;  %708 = vmatpush.bf16.msrb.mxu2 %v1067_v58  ;;  %v1111_v58 = vor.u32 %v1220_v55, %v1108_v56 }
  0x60   :  { %749 = vmatpush.bf16.msra.mxu1 %v1143_v53 }
  0xb6   :  { %v316_v46 = vpop.f32.mrf.mxu0 }
  0xb7   :  { %v317_v48 = vadd.f32 %v316_v46, %v139_v44  ;;  %v1139_v46 = vor.u32 %v1229_v10, %v1138_v42  ;;  %v1222_v42 = vld [vmem:[#allocation10 + $0xb4] sm:$0xf] }
  0xb8   :  { %v330_v15 = vpop.f32.mrf.mxu1  ;;  %v1119_v10 = vor.u32 %v1222_v42, %v1116_v43 }
  0xb9   :  { %1242 = vtanh.f32 %v317_v48  ;;  %v331_v29 = vadd.f32 %v330_v15, %v140_v25  ;;  %721 = vmatpush.bf16.msrb.mxu3 %v1139_v46  ;;  %v1225_v15 = vld [vmem:[#allocation10 + $0xc4] sm:$0xf0]  ;;  %v1106_v46 = vld [vmem:[#allocation10 + $0xa0] sm:$0xf] }
  0xba   :  { %v1107_v53 = vor.u32 %v1221_v49, %v1106_v46 }
  0xbd   :  { %722 = vmatpush.bf16.msrb.mxu3 %v1131_v59  ;;  %v1034_v59 = vld [vmem:[#allocation10 + $0x10] sm:$0xf] }
  0xbe   :  { %v318_v1 = vpop.f32.mrf.mxu0 }
  0xbf   :  { %v1243_v2 = vpop.eup %1242  ;;  %v319_v5 = vadd.f32 %v318_v1, %v139_v44  ;;  %v1212_v44 = vld [vmem:[#allocation10 + $0x64] sm:$0xf]  ;;  %v1071_v1 = vor.u32 %v1210_v60, %v1068_v62  ;;  %v1203_v60 = vld [vmem:[#allocation10 + $0x14] sm:$0xf0]  ;;  %v1098_v62 = vld [vmem:[#allocation10 + $0x90] sm:$0xf] }
  0xc0   :  { %v797_v6 = vmul.f32 %v1243_v2, %v1243_v2  ;;  %v365_v12 = vmul.f32 1.442695, %v1243_v2  ;;  %v332_v28 = vpop.f32.mrf.mxu1  ;;  %v1079_v48 = vor.u32 %v1212_v44, %v1076_v45  ;;  %v1132_v2 = vld [vmem:[#allocation10 + $0xd8] sm:$0xf0]  ;;  %v1042_v44 = vld [vmem:[#allocation10 + $0x20] sm:$0xf] }
  0xc1   :  { %1244 = vtanh.f32 %v319_v5  ;;  %v333_v33 = vadd.f32 %v332_v28, %v140_v25  ;;  %v1135_v5 = vor.u32 %v1226_v63, %v1132_v2  ;;  %v1124_v25 = vld [vmem:[#allocation10 + $0xc8] sm:$0xf0]  ;;  %v1205_v45 = vld [vmem:[#allocation10 + $0x24] sm:$0xf0]  ;;  %v1035_v63 = vor.u32 %v1203_v60, %v1034_v59  ;;  %v1202_v2 = vld [vmem:[#allocation10 + $0x14] sm:$0xf] }
  0xc2   :  { %v799_v14 = vsub.f32 1.0, %v797_v6  ;;  %1246 = vpow2.f32 %v365_v12  ;;  %735 = vmatpush.bf16.msra.mxu0 %v1079_v48  ;;  %v1058_v6 = vld [vmem:[#allocation10 + $0x40] sm:$0xf]  ;;  %v1043_v48 = vor.u32 %v1205_v45, %v1042_v44 }
  0xc3   :  { %750 = vmatpush.bf16.msra.mxu1 %v1135_v5  ;;  %v1122_v12 = vld [vmem:[#allocation10 + $0xc0] sm:$0xf]  ;;  %v1036_v5 = vld [vmem:[#allocation10 + $0x18] sm:$0xf0] }
  0xc4   :  { %v1537_v17 = vmul.f32 %v799_v14, %v101_v11 }
  0xc6   :  { %736 = vmatpush.bf16.msra.mxu0 %v1071_v1  ;;  %v1219_v1 = vld [vmem:[#allocation10 + $0x94] sm:$0xf0] }
  0xc7   :  { %v1245_v18 = vpop.eup %1244 }
  0xc8   :  { %v367_v20 = vmul.f32 1.442695, %v1245_v18  ;;  %v798_v21 = vmul.f32 %v1245_v18, %v1245_v18  ;;  %v1540_v26 = vpop.eup %1246  ;;  %v1208_v18 = vld [vmem:[#allocation10 + $0x44] sm:$0xf] }
  0xc9   :  { %v369_v30 = vmul.f32 %v1540_v26, %v101_v11  ;;  %v1209_v11 = vld [vmem:[#allocation10 + $0x44] sm:$0xf0] }
  0xca   :  { %1248 = vpow2.f32 %v367_v20  ;;  %v800_v24 = vsub.f32 1.0, %v798_v21  ;;  %v1059_v14 = vor.u32 %v1209_v11, %v1058_v6  ;;  %v1060_v20 = vld [vmem:[#allocation10 + $0x48] sm:$0xf0]  ;;  %v1123_v21 = vor.u32 %v1225_v15, %v1122_v12  ;;  %v1218_v12 = vld [vmem:[#allocation10 + $0x94] sm:$0xf] }
  0xcb   :  { %v371_v35 = vadd.f32 %v369_v30, %v331_v29  ;;  %v1050_v29 = vld [vmem:[#allocation10 + $0x30] sm:$0xf]  ;;  %v1207_v30 = vld [vmem:[#allocation10 + $0x34] sm:$0xf0]  ;;  %v1099_v6 = vor.u32 %v1219_v1, %v1098_v62  ;;  %v1039_v11 = vor.u32 %v1202_v2, %v1036_v5  ;;  %v1026_v15 = vld [vmem:[#allocation10] sm:$0xf] }
  0xcc   :  { %v1542_v27 = vmul.f32 %v800_v24, %v103_v22  ;;  %v1224_v24 = vld [vmem:[#allocation10 + $0xc4] sm:$0xf]  ;;  %709 = vmatpush.bf16.msrb.mxu2 %v1059_v14  ;;  %723 = vmatpush.bf16.msrb.mxu3 %v1123_v21  ;;  %v1100_v14 = vld [vmem:[#allocation10 + $0x98] sm:$0xf0]  ;;  %v1090_v21 = vld [vmem:[#allocation10 + $0x80] sm:$0xf] }
  0xcd   :  { %v1127_v28 = vor.u32 %v1224_v24, %v1124_v25 }
  0xcf   :  { %751 = vmatpush.bf16.msra.mxu1 %v1127_v28  ;;  %v1200_v28 = vld [vmem:[#allocation10 + $0x4] sm:$0xf] }
  0xd0   :  { %v1545_v32 = vpop.eup %1248 }
  0xd1   :  { %v370_v34 = vmul.f32 %v1545_v32, %v103_v22  ;;  %v1063_v22 = vor.u32 %v1208_v18, %v1060_v20  ;;  %v1103_v18 = vor.u32 %v1218_v12, %v1100_v14  ;;  %v1201_v20 = vld [vmem:[#allocation10 + $0x4] sm:$0xf0] }
  0xd2   :  { %v1027_v24 = vor.u32 %v1201_v20, %v1026_v15 }
  0xd3   :  { %v372_v36 = vadd.f32 %v370_v34, %v333_v33  ;;  %737 = vmatpush.bf16.msra.mxu0 %v1063_v22  ;;  %v1114_v33 = vld [vmem:[#allocation10 + $0xb0] sm:$0xf]  ;;  %v1051_v34 = vor.u32 %v1207_v30, %v1050_v29  ;;  %752 = vmatpush.bf16.msra.mxu1 %v1119_v10  ;;  %v1217_v22 = vld [vmem:[#allocation10 + $0x84] sm:$0xf0]  ;;  %v1028_v29 = vld [vmem:[#allocation10 + $0x8] sm:$0xf0] }
  0xd4   :  { %v1091_v25 = vor.u32 %v1217_v22, %v1090_v21  ;;  %v1216_v30 = vld [vmem:[#allocation10 + $0x84] sm:$0xf] }
  0xd5   :  { %v373_v37 = vpack.c.bf16 %v372_v36, %v371_v35  ;;  %v1223_v35 = vld [vmem:[#allocation10 + $0xb4] sm:$0xf0]  ;;  %v1206_v36 = vld [vmem:[#allocation10 + $0x34] sm:$0xf]  ;;  %710 = vmatpush.bf16.msrb.mxu2 %v1051_v34  ;;  %v1092_v34 = vld [vmem:[#allocation10 + $0x88] sm:$0xf0] }
  0xd6   :  { %v1115_v40 = vor.u32 %v1223_v35, %v1114_v33  ;;  %v1031_v33 = vor.u32 %v1200_v28, %v1028_v29  ;;  %v1095_v35 = vor.u32 %v1216_v30, %v1092_v34 }
  0xd7   :  { %478 = vmatmul.bf16.vlgmr.msrb.gmra.mxu0 %v373_v37  ;;  %492 = vmatmul.bf16.vlgmr.msrb.gmra.mxu1 %v373_v37  ;;  %v1052_v37 = vld [vmem:[#allocation10 + $0x38] sm:$0xf0] }
  0xd8   :  { %v1055_v41 = vor.u32 %v1206_v36, %v1052_v37  ;;  %724 = vmatpush.bf16.msrb.mxu3 %v1115_v40  ;;  %753 = vmatpush.bf16.msra.mxu1 %v1111_v58  ;;  %v344_v36 = vpop.f32.mrf.mxu2  ;;  %v358_v37 = vpop.f32.mrf.mxu3  ;;  %v141_v40 = vperm.slane %v1534_v38, 2 }
  0xd9   :  { %711 = vmatpush.bf16.msrb.mxu2 %v1043_v48 }
  0xda   :  { %738 = vmatpush.bf16.msra.mxu0 %v1055_v41  ;;  %v142_v41 = vperm.slane %v1534_v38, 3 }
  0xdc   :  { %725 = vmatpush.bf16.msrb.mxu3 %v1107_v53  ;;  %754 = vmatpush.bf16.msra.mxu1 %v1103_v18 }
  0xdd   :  { %712 = vmatpush.bf16.msrb.mxu2 %v1035_v63 }
  0xde   :  { %739 = vmatpush.bf16.msra.mxu0 %v1047_v54 }
  0xe0   :  { %726 = vmatpush.bf16.msrb.mxu3 %v1099_v6  ;;  %755 = vmatpush.bf16.msra.mxu1 %v1095_v35 }
  0xe1   :  { %713 = vmatpush.bf16.msrb.mxu2 %v1027_v24 }
  0xe2   :  { %740 = vmatpush.bf16.msra.mxu0 %v1039_v11 }
  0xe4   :  { %727 = vmatpush.bf16.msrb.mxu3 %v1091_v25 }
  0xe5   :  { %763 = vmatpush.bf16.msra.mxu2 %v1480_v3  ;;  %v345_v3 = vadd.f32 %v344_v36, %v141_v40 }
  0xe6   :  { %741 = vmatpush.bf16.msra.mxu0 %v1031_v33 }
  0xe8   :  { %777 = vmatpush.bf16.msra.mxu3 %v1485_v8  ;;  %v346_v8 = vpop.f32.mrf.mxu2 }
  0xe9   :  { %764 = vmatpush.bf16.msra.mxu2 %v1483_v7  ;;  %v359_v7 = vadd.f32 %v358_v37, %v142_v41  ;;  %v347_v44 = vadd.f32 %v346_v8, %v141_v40 }
  0xec   :  { %778 = vmatpush.bf16.msra.mxu3 %v1488_v13  ;;  %v360_v13 = vpop.f32.mrf.mxu3 }
  0xed   :  { %765 = vmatpush.bf16.msra.mxu2 %v1491_v16 }
  0xf0   :  { %779 = vmatpush.bf16.msra.mxu3 %v1494_v19  ;;  %v361_v19 = vadd.f32 %v360_v13, %v142_v41 }
  0xf1   :  { %766 = vmatpush.bf16.msra.mxu2 %v1497_v23 }
  0xf4   :  { %780 = vmatpush.bf16.msra.mxu3 %v1500_v31 }
  0xf5   :  { %767 = vmatpush.bf16.msra.mxu2 %v1503_v39 }
  0xf8   :  { %781 = vmatpush.bf16.msra.mxu3 %v1506_v47 }
  0xf9   :  { %768 = vmatpush.bf16.msra.mxu2 %v1509_v51 }
  0xfc   :  { %782 = vmatpush.bf16.msra.mxu3 %v1512_v57  ;;  %v540_v57 = vld [vmem:[%s1584_s5] sm:$0x3]  ;;  %s1423_s5 = smov [#allocation11]  }
  0xfd   :  { %769 = vmatpush.bf16.msra.mxu2 %v1515_v61  ;;  %v542_v61 = vperm.slane %v540_v57, 0  ;;  %v543_v59 = vperm.slane %v540_v57, 1  ;;  %s815_s23 = sshll.u32 %s1423_s5, 4  ;;  %s816_s23 = int_to_ptr.vmem [resolvable:$true] %s815_s23 }
 0x100   :  { %783 = vmatpush.bf16.msra.mxu3 %v1518_v0 }
 0x101   :  { %770 = vmatpush.bf16.msra.mxu2 %v1521_v4 }
 0x104   :  { %784 = vmatpush.bf16.msra.mxu3 %v1524_v9 }
 0x154   :  { %v479_v42 = vpop.f32.mrf.mxu0  ;;  %v493_v43 = vpop.f32.mrf.mxu1 }
 0x155   :  { %v498_v10 = vadd.f32 %v479_v42, %v345_v3  ;;  %v499_v16 = vadd.f32 %v493_v43, %v359_v7 }
 0x157   :  { %1250 = vtanh.f32 %v498_v10 }
 0x158   :  { %1252 = vtanh.f32 %v499_v16 }
 0x15c   :  { %v481_v45 = vpop.f32.mrf.mxu0  ;;  %v495_v38 = vpop.f32.mrf.mxu1 }
 0x15d   :  { %v500_v23 = vadd.f32 %v481_v45, %v347_v44  ;;  %v501_v46 = vadd.f32 %v495_v38, %v361_v19  ;;  %v1251_v31 = vpop.eup %1250 }
 0x15e   :  { %v1253_v39 = vpop.eup %1252 }
 0x15f   :  { %1254 = vtanh.f32 %v500_v23 }
 0x160   :  { %1256 = vtanh.f32 %v501_v46 }
 0x161   :  { %1258 = vrcp.f32 %v1540_v26 }
 0x162   :  { %1260 = vrcp.f32 %v1545_v32 }
 0x165   :  { %v1255_v47 = vpop.eup %1254 }
 0x166   :  { %v1257_v51 = vpop.eup %1256  ;;  %v506_v48 = vpack.c.bf16 %v1255_v47, %v1251_v31 }
 0x167   :  { %v507_v49 = vpack.c.bf16 %v1257_v51, %v1253_v39  ;;  %v1259_v11 = vpop.eup %1258 }
 0x168   :  { %714 = vmatmul.bf16.vlgmr.msrb.gmra.mxu2 %v506_v48  ;;  %742 = vmatmul.bf16.vlgmr.msra.gmra.mxu0 %v506_v48  ;;  %v1261_v26 = vpop.eup %1260 }
 0x169   :  { %728 = vmatmul.bf16.vlgmr.msrb.gmra.mxu3 %v507_v49  ;;  %756 = vmatmul.bf16.vlgmr.msra.gmra.mxu1 %v507_v49 }
 0x1e5   :  { %v743_v58 = vpop.f32.mrf.mxu0 }
 0x1e6   :  { %v744_v60 = vadd.f32 %v743_v58, %v543_v59  ;;  %v757_v62 = vpop.f32.mrf.mxu1 }
 0x1e8   :  { %v758_v63 = vadd.f32 %v757_v62, %v744_v60 }
 0x1eb   :  { %v715_v0 = vpop.f32.mrf.mxu2 }
 0x1ec   :  { %v716_v50 = vadd.f32 %v715_v0, %v542_v61  ;;  %v729_v52 = vpop.f32.mrf.mxu3 }
 0x1ed   :  { %v745_v1 = vpop.f32.mrf.mxu0 }
 0x1ee   :  { %v730_v53 = vadd.f32 %v729_v52, %v716_v50  ;;  %v746_v12 = vadd.f32 %v745_v1, %v543_v59  ;;  %v759_v20 = vpop.f32.mrf.mxu1 }
 0x1f0   :  { %807 = vst [vmem:[#allocation11] sm:$0xff] %v730_v53  ;;  %v760_v21 = vadd.f32 %v759_v20, %v746_v12 }
 0x1f3   :  { %v717_v4 = vpop.f32.mrf.mxu2 }
 0x1f4   :  { %v718_v54 = vadd.f32 %v717_v4, %v542_v61  ;;  %v731_v9 = vpop.f32.mrf.mxu3 }
 0x1f6   :  { %v732_v55 = vadd.f32 %v731_v9, %v718_v54 }
 0x1f8   :  { %v762_v56 = vpack.c.bf16 %v732_v55, %v730_v53  ;;  %808 = vst [vmem:[#allocation11 + $0x10] sm:$0xff] %v732_v55 }
 0x1fa   :  { %771 = vmatmul.bf16.vlgmr.msra.gmra.mxu2 %v762_v56  ;;  %785 = vmatmul.bf16.vlgmr.msra.gmra.mxu3 %v762_v56 }
 0x27d   :  { %v772_v2 = vpop.f32.mrf.mxu2  ;;  %v786_v5 = vpop.f32.mrf.mxu3 }
 0x27e   :  { %v793_v6 = vsub.f32 %v758_v63, %v786_v5  ;;  %v803_v14 = vmul.f32 %v1537_v17, %v772_v2 }
 0x280   :  { %v795_v15 = vmul.f32 %v1259_v11, %v793_v6 }
 0x282   :  { %v805_v18 = vsub.f32 %v795_v15, %v803_v14 }
 0x284   :  { %809 = vst [vmem:[#allocation11 + $0x8] sm:$0xff] %v805_v18 }
 0x285   :  { %v774_v22 = vpop.f32.mrf.mxu2  ;;  %v788_v24 = vpop.f32.mrf.mxu3 }
 0x286   :  { %v794_v25 = vsub.f32 %v760_v21, %v788_v24  ;;  %v804_v28 = vmul.f32 %v1542_v27, %v774_v22 }
 0x288   :  { %v796_v17 = vmul.f32 %v1261_v26, %v794_v25 }
 0x28a   :  { %v806_v29 = vsub.f32 %v796_v17, %v804_v28 }
 0x28c   :  { %810 = vst [vmem:[#allocation11 + $0x18] sm:$0xff] %v806_v29 }
 0x28d   :  { %823 = dma.vmem_to_hbm [thread:$0]  %s816_s23, 512, %s818_s26, [#allocation4], %s1415_s29, %s1415_s29, %s1416_s30  }
 0x28e   :  { %1412 = dma.done.wait [#allocation4], 512  }
 0x28f   :  { %1413 = vsyncadd [#allocation4], 4294966784 }
 0x290   :  { %828 = vsyncpa [#allocation3], 1 }
 0x291   :  { %829 = vsyncpa [#allocation6], 1 }
 0x292   :  { %830 = vsyncpa [#allocation9], 1 }
 0x293   :  { %831 = vsyncpa [#allocation4], 1 }

</bundles_post_ra>
